<compile_context>
chip_gen: v7x
topology: tpu7x:2x2x1
jax: 0.10.0
libtpu: 0.0.40
codegen_flags: <defaults>
</compile_context>

<pallas_src>
import functools

import jax
import jax.numpy as jnp
from jax.experimental import pallas as pl
from jax.experimental.pallas import tpu as pltpu


def _round_up(x: int, m: int) -> int:
    return ((x + m - 1) // m) * m


def _policy_kernel(xt_ref, w1t_ref, b1t_ref, w2t_ref, b2t_ref, ot_ref, *,
                   action_bound, neg_slope):
    # fc1 (transposed): (H, S) @ (S, TB) + (H, 1) -> (H, TB); f32 MXU accum,
    # batch streams through the full lane width of the MXU.
    h = jnp.dot(w1t_ref[...], xt_ref[...],
                preferred_element_type=jnp.float32) + b1t_ref[...]
    # leaky_relu (PyTorch default negative_slope = 0.01) on lane-dense tiles.
    h = jnp.where(h > 0, h, neg_slope * h)
    # fc2 (transposed): (A, H) @ (H, TB) + (A, 1) -> (A, TB).
    a = jnp.dot(w2t_ref[...], h,
                preferred_element_type=jnp.float32) + b2t_ref[...]
    # tanh (EUP) * action_bound, then a single lane-dense store.
    ot_ref[...] = (jnp.tanh(a) * action_bound).astype(ot_ref.dtype)


def policy_net_forward(x, w1, b1, w2, b2, action_bound, *,
                       block_batch: int = 8192):
    """x: (B, state_dim). w1: (state_dim, hidden). b1: (1, hidden).
    w2: (hidden, action_dim). b2: (1, action_dim). Returns (B, action_dim) f32.

    Internally the batch is placed on the lane axis: the kernel consumes
    x^T (state_dim, B_pad) tiled as (state_dim, TB) blocks and produces
    out^T (action_dim, B_pad); the wrapper transposes/slices back. TB is a
    multiple of 128, capped so the grid keeps >= 2 steps when possible
    (v7x megacore). VMEM per step is tiny in this layout (< 2 MiB even at
    TB = 8192), far under the 32 MiB scoped limit on v5e/v6e/v7x.
    """
    batch, state_dim = x.shape
    hidden_dim, action_dim = w2.shape

    # Batch tile on the lane axis: multiple of 128.
    b128 = _round_up(batch, 128)
    tb = max(128, min(_round_up(block_batch, 128), b128))
    # Keep >= 2 grid steps when the batch permits so the "parallel" grid axis
    # can be sharded across v7x's two TensorCores.
    if b128 >= 2 * 128 and tb > b128 // 2:
        tb = _round_up(b128 // 2, 128)
    b_pad = _round_up(batch, tb)

    # Transposed operands: batch on lanes; weight/bias transposes are tiny.
    xt = jnp.pad(x, ((0, b_pad - batch), (0, 0))).T        # (S, B_pad)
    w1t = w1.T                                             # (H, S)
    b1t = b1.reshape(hidden_dim, 1)                        # (H, 1)
    w2t = w2.T                                             # (A, H)
    b2t = b2.reshape(action_dim, 1)                        # (A, 1)

    grid = (b_pad // tb,)

    kernel = functools.partial(
        _policy_kernel, action_bound=float(action_bound), neg_slope=0.01)

    bytes_f32 = 4
    cost = pl.CostEstimate(
        flops=2 * batch * (state_dim * hidden_dim + hidden_dim * action_dim),
        transcendentals=batch * action_dim,  # tanh
        bytes_accessed=bytes_f32 * (batch * state_dim        # x read
                                    + batch * action_dim     # out write
                                    + state_dim * hidden_dim  # w1
                                    + hidden_dim              # b1
                                    + hidden_dim * action_dim  # w2
                                    + action_dim),             # b2
    )

    out_t = pl.pallas_call(
        kernel,
        out_shape=jax.ShapeDtypeStruct((action_dim, b_pad), jnp.float32),
        grid=grid,
        in_specs=[
            # x^T: tiled along the lane (batch) axis, auto double-buffered.
            pl.BlockSpec((state_dim, tb), lambda i: (0, i)),
            # Weights / biases: constant block index -> VMEM-resident.
            pl.BlockSpec(w1t.shape, lambda i: (0, 0)),
            pl.BlockSpec(b1t.shape, lambda i: (0, 0)),
            pl.BlockSpec(w2t.shape, lambda i: (0, 0)),
            pl.BlockSpec(b2t.shape, lambda i: (0, 0)),
        ],
        # Lane-dense output: (action_dim, TB) blocks, unmasked stores.
        out_specs=pl.BlockSpec((action_dim, tb), lambda i: (0, i)),
        compiler_params=pltpu.CompilerParams(
            # Independent batch tiles: shard grid steps across v7x's 2 TCs;
            # harmless no-op on v5e/v6e.
            dimension_semantics=("parallel",),
            # Conservative vs v7x's 64 MiB physical VMEM.
            vmem_limit_bytes=32 << 20,
        ),
        cost_estimate=cost,
    )(xt, w1t, b1t, w2t, b2t)

    # (A, B_pad) -> (B, A)
    return out_t[:, :batch].T


def init_policy_params(key, state_dim, hidden_dim, action_dim):
    """Deterministic init mimicking the PyTorch module:
    weights ~ Normal(0, 0.1); biases use default nn.Linear uniform init.
    Weights stored pre-transposed as (in_features, out_features)."""
    k1, k2, k3, k4 = jax.random.split(key, 4)
    w1 = 0.1 * jax.random.normal(k1, (state_dim, hidden_dim), dtype=jnp.float32)
    w2 = 0.1 * jax.random.normal(k2, (hidden_dim, action_dim), dtype=jnp.float32)
    bound1 = 1.0 / jnp.sqrt(state_dim)
    bound2 = 1.0 / jnp.sqrt(hidden_dim)
    b1 = jax.random.uniform(k3, (1, hidden_dim), jnp.float32, -bound1, bound1)
    b2 = jax.random.uniform(k4, (1, action_dim), jnp.float32, -bound2, bound2)
    return w1, b1, w2, b2


def reference_forward(x, w1, b1, w2, b2, action_bound):
    h = x @ w1 + b1
    h = jnp.where(h > 0, h, 0.01 * h)
    a = h @ w2 + b2
    return jnp.tanh(a) * action_bound


if __name__ == "__main__":
    state_dim = 4
    hidden_dim = 32
    action_dim = 2
    action_bound = 2.0

    key = jax.random.PRNGKey(0)
    kx, kp, kx2 = jax.random.split(key, 3)
    w1, b1, w2, b2 = init_policy_params(kp, state_dim, hidden_dim, action_dim)

    # Small case (single grid step, batch padded 2 -> 128 inside the wrapper).
    batch = 2
    x = jax.random.normal(kx, (batch, state_dim), dtype=jnp.float32)
    out = policy_net_forward(x, w1, b1, w2, b2, action_bound)
    out = jax.block_until_ready(out)
    ref = reference_forward(x, w1, b1, w2, b2, action_bound)
    assert out.shape == (batch, action_dim)
    assert jnp.allclose(out, ref, atol=1e-5, rtol=1e-5), "mismatch vs reference (small)"

    # Larger case exercising the batch grid (>= 2 tiles for v7x megacore,
    # weights resident across steps).
    big_batch = 4096
    xb = jax.random.normal(kx2, (big_batch, state_dim), dtype=jnp.float32)
    out_b = policy_net_forward(xb, w1, b1, w2, b2, action_bound)
    out_b = jax.block_until_ready(out_b)
    ref_b = reference_forward(xb, w1, b1, w2, b2, action_bound)
    assert out_b.shape == (big_batch, action_dim)
    assert jnp.allclose(out_b, ref_b, atol=1e-5, rtol=1e-5), "mismatch vs reference (tiled)"

    # Non-multiple-of-128 batch (padding + slicing path).
    odd_batch = 300
    xo = jax.random.normal(kx2, (odd_batch, state_dim), dtype=jnp.float32)
    out_o = policy_net_forward(xo, w1, b1, w2, b2, action_bound)
    out_o = jax.block_until_ready(out_o)
    ref_o = reference_forward(xo, w1, b1, w2, b2, action_bound)
    assert out_o.shape == (odd_batch, action_dim)
    assert jnp.allclose(out_o, ref_o, atol=1e-5, rtol=1e-5), "mismatch vs reference (odd)"

    print("KERNEL_OK")
</pallas_src>

<mosaic_0001>
module attributes {stable_mosaic.version = 11 : i64} {
  func.func @_policy_kernel(%arg0: i32, %arg1: memref<4x128xf32, #tpu.memory_space<vmem>>, %arg2: memref<32x4xf32, #tpu.memory_space<vmem>>, %arg3: memref<32x1xf32, #tpu.memory_space<vmem>>, %arg4: memref<2x32xf32, #tpu.memory_space<vmem>>, %arg5: memref<2x1xf32, #tpu.memory_space<vmem>>, %arg6: memref<2x128xf32, #tpu.memory_space<vmem>>) attributes {dimension_semantics = [#tpu.dimension_semantics<parallel>], iteration_bounds = array<i64: 1>, scalar_prefetch = 0 : i64, scratch_operands = 0 : i64, tpu.core_type = #tpu.core_type<tc>, window_params = [{transform_indices = @transform_0, window_bounds = array<i64: 4, 128>}, {pipeline_mode = #tpu.pipeline_mode<synchronous>, transform_indices = @transform_1, window_bounds = array<i64: 32, 4>}, {pipeline_mode = #tpu.pipeline_mode<synchronous>, transform_indices = @transform_2, window_bounds = array<i64: 32, 1>}, {pipeline_mode = #tpu.pipeline_mode<synchronous>, transform_indices = @transform_3, window_bounds = array<i64: 2, 32>}, {pipeline_mode = #tpu.pipeline_mode<synchronous>, transform_indices = @transform_4, window_bounds = array<i64: 2, 1>}, {transform_indices = @transform_5, window_bounds = array<i64: 2, 128>}]} {
    %c0 = arith.constant 0 : index
    %c0_0 = arith.constant 0 : index
    %0 = vector.load %arg2[%c0, %c0_0] : memref<32x4xf32, #tpu.memory_space<vmem>>, vector<32x4xf32>
    %c0_1 = arith.constant 0 : index
    %c0_2 = arith.constant 0 : index
    %1 = vector.load %arg1[%c0_1, %c0_2] : memref<4x128xf32, #tpu.memory_space<vmem>>, vector<4x128xf32>
    %cst = arith.constant dense<0.000000e+00> : vector<32x128xf32>
    %2 = tpu.matmul %0, %1, %cst {dimension_numbers = #tpu.dot_dimension_numbers<[1], [0], [0], [1], [0, 0, 1, 1], [], []>} : vector<32x4xf32>, vector<4x128xf32>, vector<32x128xf32> -> vector<32x128xf32>
    %c0_3 = arith.constant 0 : index
    %c0_4 = arith.constant 0 : index
    %3 = vector.load %arg3[%c0_3, %c0_4] : memref<32x1xf32, #tpu.memory_space<vmem>>, vector<32x1xf32>
    %4 = vector.broadcast %3 : vector<32x1xf32> to vector<32x128xf32>
    %5 = arith.addf %2, %4 : vector<32x128xf32>
    %cst_5 = arith.constant 0.000000e+00 : f32
    %6 = vector.broadcast %cst_5 : f32 to vector<32x128xf32>
    %7 = arith.cmpf ogt, %5, %6 : vector<32x128xf32>
    %cst_6 = arith.constant 0.00999999977 : f32
    %8 = vector.broadcast %cst_6 : f32 to vector<32x128xf32>
    %9 = arith.mulf %8, %5 : vector<32x128xf32>
    %10 = arith.select %7, %5, %9 : vector<32x128xi1>, vector<32x128xf32>
    %c0_7 = arith.constant 0 : index
    %c0_8 = arith.constant 0 : index
    %11 = vector.load %arg4[%c0_7, %c0_8] : memref<2x32xf32, #tpu.memory_space<vmem>>, vector<2x32xf32>
    %cst_9 = arith.constant dense<0.000000e+00> : vector<2x128xf32>
    %12 = tpu.matmul %11, %10, %cst_9 {dimension_numbers = #tpu.dot_dimension_numbers<[1], [0], [0], [1], [0, 0, 1, 1], [], []>} : vector<2x32xf32>, vector<32x128xf32>, vector<2x128xf32> -> vector<2x128xf32>
    %c0_10 = arith.constant 0 : index
    %c0_11 = arith.constant 0 : index
    %13 = vector.load %arg5[%c0_10, %c0_11] : memref<2x1xf32, #tpu.memory_space<vmem>>, vector<2x1xf32>
    %14 = vector.broadcast %13 : vector<2x1xf32> to vector<2x128xf32>
    %15 = arith.addf %12, %14 : vector<2x128xf32>
    %16 = math.tanh %15 : vector<2x128xf32>
    %cst_12 = arith.constant 2.000000e+00 : f32
    %17 = vector.broadcast %cst_12 : f32 to vector<2x128xf32>
    %18 = arith.mulf %16, %17 : vector<2x128xf32>
    %c0_13 = arith.constant 0 : index
    %c0_14 = arith.constant 0 : index
    %19 = vector.load %arg6[%c0_13, %c0_14] : memref<2x128xf32, #tpu.memory_space<vmem>>, vector<2x128xf32>
    tpu.vector_store %arg6[%c0_13, %c0_14], %18 {strides = array<i32>} : memref<2x128xf32, #tpu.memory_space<vmem>>, vector<2x128xf32>,
    return
  }
  func.func @transform_0(%arg0: i32) -> (i32, i32) {
    %c0_i32 = arith.constant 0 : i32
    %c0_i32_0 = arith.constant 0 : i32
    return %c0_i32, %arg0 : i32, i32
  }
  func.func @transform_1(%arg0: i32) -> (i32, i32) {
    %c0_i32 = arith.constant 0 : i32
    %c0_i32_0 = arith.constant 0 : i32
    %c0_i32_1 = arith.constant 0 : i32
    return %c0_i32, %c0_i32_0 : i32, i32
  }
  func.func @transform_2(%arg0: i32) -> (i32, i32) {
    %c0_i32 = arith.constant 0 : i32
    %c0_i32_0 = arith.constant 0 : i32
    %c0_i32_1 = arith.constant 0 : i32
    return %c0_i32, %c0_i32_0 : i32, i32
  }
  func.func @transform_3(%arg0: i32) -> (i32, i32) {
    %c0_i32 = arith.constant 0 : i32
    %c0_i32_0 = arith.constant 0 : i32
    %c0_i32_1 = arith.constant 0 : i32
    return %c0_i32, %c0_i32_0 : i32, i32
  }
  func.func @transform_4(%arg0: i32) -> (i32, i32) {
    %c0_i32 = arith.constant 0 : i32
    %c0_i32_0 = arith.constant 0 : i32
    %c0_i32_1 = arith.constant 0 : i32
    return %c0_i32, %c0_i32_0 : i32, i32
  }
  func.func @transform_5(%arg0: i32) -> (i32, i32) {
    %c0_i32 = arith.constant 0 : i32
    %c0_i32_0 = arith.constant 0 : i32
    return %c0_i32, %arg0 : i32, i32
  }
}

</mosaic_0001>

<bundles_post_ra>
// kernel: tpu_custom_call.1
= control target key start
LH: loop header
LB: loop body
LE: loop exit
PB: predicated region body
PF: predicated region fallthrough
CT: control target
= control target key end

     0   :  { %vm63_vm0 = vcmask 1043456   ;;  %vm50_vm1 = vcmask 31744   ;;  %v336_v5 = vmov 0   ;;  %s420_s0 = inlined_call_operand.vmem [shape: f32[4,128], index: 0, kind: input, shape index: {}]   ;;  %s421_s1 = inlined_call_operand.vmem [shape: f32[32,4], index: 1, kind: input, shape index: {}]   ;;  %s422_s2 = inlined_call_operand.vmem [shape: f32[32,1], index: 2, kind: input, shape index: {}]   ;;  %s423_s3 = inlined_call_operand.vmem [shape: f32[2,32], index: 3, kind: input, shape index: {}]   ;;  %s424_s4 = inlined_call_operand.vmem [shape: f32[2,1], index: 4, kind: input, shape index: {}]   ;;  %s425_s5 = inlined_call_operand.hbm [shape: f32[2,128], index: 5, kind: output, shape index: {}]  }
   0x1   :  { %v25_v0 = vld [vmem:[%s420_s0] sm:$0xf]  ;;  %v22_v2 = vld [vmem:[%s421_s1 + $0x8] sm:$0xff]  ;;  %v23_v3 = vld [vmem:[%s421_s1 + $0x10] sm:$0xff]  ;;  %308 = vset.pattern.permute.xlu0 %v336_v5 }
   0x2   :  { %v21_v1 = vld [vmem:[%s421_s1] sm:$0xff]  ;;  %278 = vmatprep.subr.msk.mxu0 %vm63_vm0, %v25_v0  ;;  %v28_v6 = vld [vmem:[%s422_s2 + $0x10] sm:$0xff] }
   0x3   :  { %280 = vmatprep.mubr.msk.f32.mxu0 %vm50_vm1, %v21_v1  ;;  %v26_v4 = vld [vmem:[%s422_s2] sm:$0xff]  ;;  %279 = vmatpush3.msk.msra.mxu0 %vm63_vm0, %v25_v0 }
   0x4   :  { %281 = vmatmul.mubr.msk.f32.vlgmr.msra.gmra.mrb[0].mxu0 %vm50_vm1, %v22_v2  ;;  %32 = vperm.xlu0 %308, %v26_v4  }
   0x5   :  { %10 = vsyncpa [#allocation3], 0  ;;  %283 = vmatprep.mubr.msk.f32.mxu0 %vm50_vm1, %v23_v3  ;;  %v24_v7 = vld [vmem:[%s421_s1 + $0x18] sm:$0xff]  ;;  %v27_v8 = vld [vmem:[%s422_s2 + $0x8] sm:$0xff]  ;;  %309 = vset.pattern.permute.xlu1 %v336_v5  ;;  %v337_v11 = vmov 0.0|0.0   ;;  %vm338_vm2 = vmmov 0  }
   0x6   :  { %42 = vperm.xlu1 %309, %v28_v6   ;;  %v29_v9 = vld [vmem:[%s422_s2 + $0x18] sm:$0xff]  ;;  %v165_v10 = vld [vmem:[%s424_s4] sm:$0x3]  ;;  %297 = vmatprep.subr.bf16.mxu1 %v337_v11  ;;  %v339_v12 = vmov 0.0   ;;  %vm171_vm7 = vcmask 261120   ;;  %s340_s4 = smov [#allocation2]  }
   0x7   :  { %294 = vmatprep.mubr.msk.f32.mxu1 %vm338_vm2, %v339_v12  ;;  %v164_v35 = vld [vmem:[%s423_s3] sm:$0x3]  ;;  %s254_s12 = sshll.u32 %s340_s4, 4  ;;  %s255_s12 = int_to_ptr.vmem [resolvable:$true] %s254_s12 }
   0x8   :  { %284 = vmatmul.mubr.msk.f32.gmra.mrb[2].mxu0 %vm50_vm1, %v24_v7  ;;  %37 = vperm.xlu0 %308, %v27_v8   ;;  %s312_s13 = scalar_lea.vmem %s255_s12, 32  ;;  %p317_p1 = scmp.lt.s32.totalorder %s255_s12, %s255_s12 }
   0x9   :  { %p313_p0 = scmp.ne.s32.totalorder %s255_s12, %s312_s13  ;;  %p318_p2 = scmp.lt.s32.totalorder %s312_s13, %s312_s13 }
   0xa   :  { %47 = vperm.xlu1 %309, %v29_v9  }
   0xb   :  { %p319_p3 = por %p318_p2, %p317_p1 }
   0xc   :  { %168 = vperm.xlu0 %308, %v165_v10  }
   0xd   :  { %p320_p4 = pnand %p319_p3, %p313_p0 }
  0x83   :  { %v33_v13 = vpop.permute.xlu0 %32 }
  0x85   :  { %v43_v14 = vpop.permute.xlu1 %42 }
  0x87   :  { %v38_v15 = vpop.permute.xlu0 %37 }
  0x89   :  { %v48_v21 = vpop.permute.xlu1 %47 }
  0x8b   :  { %v169_v36 = vpop.permute.xlu0 %168 }
  0xd7   :  { %v282_v16 = vpop.f32.mrb[0].mxu0 }
  0xd8   :  { %v139_v17 = vadd.f32 %v282_v16, %v38_v15  ;;  %v133_v18 = vpop.f32.mrb[1].mxu0 }
  0xd9   :  { %v134_v19 = vadd.f32 %v133_v18, %v33_v13 }
  0xda   :  { %v157_v20 = vmul.f32 0.01, %v139_v17  ;;  %vm153_vm3 = vcmp.gt.f32.partialorder %v139_v17, 0.0 }
  0xdb   :  { %v156_v22 = vmul.f32 0.01, %v134_v19  ;;  %v285_v23 = vpop.f32.mrb[2].mxu0  ;;  %vm152_vm4 = vcmp.gt.f32.partialorder %v134_v19, 0.0 }
  0xdc   :  { %v149_v24 = vadd.f32 %v285_v23, %v48_v21  ;;  %v143_v25 = vpop.f32.mrb[3].mxu0  ;;  %v161_v26 = vsel %vm153_vm3, %v139_v17, %v157_v20 }
  0xdd   :  { %v144_v27 = vadd.f32 %v143_v25, %v43_v14  ;;  %v160_v28 = vsel %vm152_vm4, %v134_v19, %v156_v22 }
  0xde   :  { %vm155_vm5 = vcmp.gt.f32.partialorder %v149_v24, 0.0  ;;  %v159_v29 = vmul.f32 0.01, %v149_v24  ;;  %v298_v30 = vpack.c.bf16 %v161_v26, %v160_v28 }
  0xdf   :  { %vm154_vm6 = vcmp.gt.f32.partialorder %v144_v27, 0.0  ;;  %v158_v31 = vmul.f32 0.01, %v144_v27 }
  0xe0   :  { %299 = vmatpush3.bf16.msra.mxu1 %v298_v30  ;;  %v163_v32 = vsel %vm155_vm5, %v149_v24, %v159_v29 }
  0xe1   :  { %300 = vmatprep.subr.bf16.mxu1 %v337_v11  ;;  %v162_v33 = vsel %vm154_vm6, %v144_v27, %v158_v31 }
  0xe2   :  { %v301_v34 = vpack.c.bf16 %v163_v32, %v162_v33 }
  0xe4   :  { %302 = vmatpush3.bf16.msra.mxu1 %v301_v34 }
  0xe7   :  { %295 = vmatmul.mubr.msk.f32.vlgmr.msra.gmra.mrb[0].mxu1 %vm171_vm7, %v164_v35 }
 0x1ba   :  { %v241_v37 = vpop.f32.mrb[0].mxu1 }
 0x1bb   :  { %v242_v38 = vadd.f32 %v241_v37, %v169_v36  ;;  %v296_v39 = vpop.f32.mrb[1].mxu1 }
 0x1bd   :  { %310 = vtanh.f32 %v242_v38 }
 0x1c7   :  { %v311_v40 = vpop.eup %310 }
 0x1c8   :  { %v246_v41 = vmul.f32 2.0, %v311_v40 }
 0x1ca   :  { %247 = vst [vmem:[#allocation2] sm:$0x3] %v246_v41 }
 0x1cb   :  { %323 = shalt.err (!%p320_p4)
}
 0x1cc   :  { %s324_s15 = scalar_lea.hbm %s425_s5, 32 }
 0x1cd   :  { %p325_p5 = scmp.ne.s32.totalorder %s425_s5, %s324_s15  ;;  %p328_p6 = scmp.lt.u32.totalorder %s324_s15, %s425_s5 }
 0x1cf   :  { %p330_p7 = pnand %p328_p6, %p325_p5 }
 0x1d1   :  { %333 = shalt.err (!%p330_p7)
}
 0x1d2   :  { %257 = dma.vmem_to_hbm [thread:$0]  %s255_s12, 32, %s425_s5, [#allocation3]  }
 0x1d3   :  { %334 = dma.done.wait [#allocation3], 32  }
 0x1d4   :  { %335 = vsyncadd [#allocation3], 4294967264 }
 0x1d5   :  { %261 = vsyncpa [#allocation3], 1 }

</bundles_post_ra>
